<compile_context>
chip_gen: v6e
topology: v6e:2x2x1
jax: 0.10.0
libtpu: 0.0.40
codegen_flags: <defaults>
</compile_context>

<pallas_src>
import functools
import math

import jax
import jax.numpy as jnp
from jax.experimental import pallas as pl
from jax.experimental.pallas import tpu as pltpu

_LANES = 128
_MAX_BLOCK_ROWS = 2048   # (2048,128) f32 tile = 1 MiB; 4 streams x 2 bufs = 8 MiB VMEM


def _num_tensorcores():
    """Best-effort TensorCore count (2 on v7x, 1 on v5e/v6e); safe fallback 1."""
    try:
        info = pltpu.get_tpu_info()
    except Exception:
        return 1
    for attr in ("num_tensorcores", "tensorcores_per_chip", "num_cores",
                 "cores_per_chip"):
        v = getattr(info, attr, None)
        if isinstance(v, int) and v > 0:
            return min(v, 2)   # no current TPU has >2 TensorCores per device
    return 1


def _kl_partial_kernel(mu_q_ref, std_q_ref, mu_p_ref, std_p_ref,
                       out_ref, acc_ref, *, rows, block_rows, bpc, acc_rows,
                       needs_edge):
    """Per-block Gaussian KL partial sums.

    Grid = (parallel slice i, sequential reduction j).  Each parallel slice
    emits one (1, 1, 128) per-lane partial-sum row; the wrapper finishes the
    cross-lane sum and the divide by n.
    """
    i = pl.program_id(0)          # "parallel" axis (TensorCore split on v7x)
    j = pl.program_id(1)          # "arbitrary" reduction axis

    @pl.when(j == 0)
    def _():
        acc_ref[...] = jnp.zeros_like(acc_ref)

    mu_q = mu_q_ref[...].astype(jnp.float32)
    std_q = std_q_ref[...].astype(jnp.float32)
    mu_p = mu_p_ref[...].astype(jnp.float32)
    std_p = std_p_ref[...].astype(jnp.float32)

    var_q = std_q * std_q
    var_p = std_p * std_p
    diff = mu_q - mu_p
    # 1/var_p via EUP approx reciprocal + one Newton-Raphson refinement
    # (~1e-7 rel error) instead of an exact multi-op VALU divide.
    r = pl.reciprocal(var_p, approx=True)
    r = r * (2.0 - var_p * r)
    kl = (jnp.log(std_p) - jnp.log(std_q)            # two EUP logs, no divide
          + (var_q + diff * diff) * (0.5 * r)
          - 0.5)

    def _accumulate(vals):
        # (block_rows,128) -> (block_rows/acc_rows, acc_rows, 128); for
        # acc_rows == 8 this matches native vreg layout, so the fold is pure
        # VALU adds and the accumulator stays vreg-resident.
        acc_ref[...] += vals.reshape(-1, acc_rows, _LANES).sum(axis=0)

    if not needs_edge:
        # Fast path: every block is full and unique -> no masks, no branches.
        _accumulate(kl)
    else:
        blk = i * bpc + j
        # Valid rows in this block: block_rows for interior blocks, fewer for
        # the final partial block, 0 for clamped duplicate blocks.
        valid = jnp.clip(rows - blk * block_rows, 0, block_rows)

        @pl.when(valid == block_rows)
        def _():
            _accumulate(kl)

        @pl.when(jnp.logical_and(valid > 0, valid < block_rows))
        def _():
            # Row-index mask only on the (single) partial edge block; also
            # neutralizes any garbage overhang rows Pallas may have DMA'd.
            ridx = jax.lax.broadcasted_iota(jnp.int32, (block_rows, _LANES), 0)
            _accumulate(jnp.where(ridx < valid, kl, 0.0))

    @pl.when(j == bpc - 1)
    def _():
        # One small cross-sublane reduce per parallel slice; cross-lane sum and
        # the divide by n are finished in the wrapper on a tiny array.
        out_ref[...] = jnp.sum(acc_ref[...], axis=0,
                               keepdims=True).reshape(1, 1, _LANES)


def kl_loss(mu_q, std_q, mu_p, std_p):
    """Pallas equivalent of KLLoss()(Normal(mu_q, std_q), Normal(mu_p, std_p))."""
    assert mu_q.shape == std_q.shape == mu_p.shape == std_p.shape
    n = int(mu_q.size)
    assert n > 0, "KL mean over zero elements is undefined"

    rows = (n + _LANES - 1) // _LANES
    padded_len = rows * _LANES

    # Largest lane-dense row tile that fits VMEM.  A block whose sublane dim
    # equals the full array dim is always legal; otherwise 2048 % 8 == 0.
    block_rows = rows if rows <= _MAX_BLOCK_ROWS else _MAX_BLOCK_ROWS
    total_blocks = (rows + block_rows - 1) // block_rows

    num_par = max(1, min(_num_tensorcores(), total_blocks))
    bpc = (total_blocks + num_par - 1) // num_par          # blocks per slice
    needs_edge = (rows % block_rows != 0) or (num_par * bpc != total_blocks)
    acc_rows = math.gcd(block_rows, 8)                     # 8 except tiny inputs

    def _prep(x, pad_value):
        x = x.reshape(-1)          # free for contiguous inputs; native dtype kept
        if padded_len != n:
            # Ragged 128-lane tail only: pad with KL-neutral constants (mu=0,
            # std=1) so no in-kernel element mask is needed.  This materializes
            # a copy - accepted, documented cost, hit only when n % 128 != 0.
            x = jnp.pad(x, (0, padded_len - n), constant_values=pad_value)
        return x.reshape(rows, _LANES)

    args = (_prep(mu_q, 0.0), _prep(std_q, 1.0),
            _prep(mu_p, 0.0), _prep(std_p, 1.0))

    if num_par * bpc == total_blocks:
        def in_map(i, j):
            return (i * bpc + j, 0)
    else:
        def in_map(i, j):
            # Clamp duplicate blocks (uneven split) to a valid block; their
            # contribution is skipped in-kernel (valid == 0), no element mask.
            return (jnp.minimum(i * bpc + j, total_blocks - 1), 0)

    in_spec = pl.BlockSpec((block_rows, _LANES), in_map)

    # TODO(synk): if an xprof profile on v7x shows only one TensorCore busy with
    # ("parallel", "arbitrary"), switch axis 0 to pltpu.CORE_PARALLEL.
    partials = pl.pallas_call(
        functools.partial(_kl_partial_kernel, rows=rows, block_rows=block_rows,
                          bpc=bpc, acc_rows=acc_rows, needs_edge=needs_edge),
        out_shape=jax.ShapeDtypeStruct((num_par, 1, _LANES), jnp.float32),
        grid_spec=pltpu.PrefetchScalarGridSpec(
            num_scalar_prefetch=0,
            grid=(num_par, bpc),
            in_specs=[in_spec, in_spec, in_spec, in_spec],
            out_specs=pl.BlockSpec((1, 1, _LANES), lambda i, j: (i, 0, 0)),
            scratch_shapes=[pltpu.VMEM((acc_rows, _LANES), jnp.float32)],
        ),
        compiler_params=pltpu.CompilerParams(
            dimension_semantics=("parallel", "arbitrary")),
    )(*args)

    return jnp.sum(partials) / jnp.float32(n)


def _kl_loss_ref(mu_q, std_q, mu_p, std_p):
    """Pure-JAX reference (matches torch.distributions.kl_divergence for Normal)."""
    mu_q, std_q, mu_p, std_p = (x.astype(jnp.float32)
                                for x in (mu_q, std_q, mu_p, std_p))
    var_q = std_q * std_q
    var_p = std_p * std_p
    kl = (jnp.log(std_p) - jnp.log(std_q)
          + (var_q + (mu_q - mu_p) ** 2) / (2.0 * var_p) - 0.5)
    return jnp.mean(kl)


if __name__ == "__main__":
    key = jax.random.PRNGKey(0)
    k1, k2, k3, k4 = jax.random.split(key, 4)

    # Small NCHW-style latent maps: batch=2, channels=4, spatial=16x16.
    shape = (2, 4, 16, 16)
    mu_q = jax.random.normal(k1, shape, dtype=jnp.float32)
    std_q = jax.nn.softplus(jax.random.normal(k2, shape, dtype=jnp.float32)) + 0.1
    mu_p = jax.random.normal(k3, shape, dtype=jnp.float32)
    std_p = jax.nn.softplus(jax.random.normal(k4, shape, dtype=jnp.float32)) + 0.1

    loss = kl_loss(mu_q, std_q, mu_p, std_p)
    jax.block_until_ready(loss)

    ref = _kl_loss_ref(mu_q, std_q, mu_p, std_p)
    assert jnp.allclose(loss, ref, rtol=1e-5, atol=1e-5), (loss, ref)

    print("KERNEL_OK")
</pallas_src>

<mosaic_0001>
module attributes {stable_mosaic.version = 11 : i64} {
  func.func @_kl_partial_kernel(%arg0: i32, %arg1: i32, %arg2: memref<16x128xf32, #tpu.memory_space<vmem>>, %arg3: memref<16x128xf32, #tpu.memory_space<vmem>>, %arg4: memref<16x128xf32, #tpu.memory_space<vmem>>, %arg5: memref<16x128xf32, #tpu.memory_space<vmem>>, %arg6: memref<1x1x128xf32, #tpu.memory_space<vmem>>, %arg7: memref<8x128xf32, #tpu.memory_space<vmem>>) attributes {dimension_semantics = [#tpu.dimension_semantics<parallel>, #tpu.dimension_semantics<arbitrary>], iteration_bounds = array<i64: 1, 1>, scalar_prefetch = 0 : i64, scratch_operands = 1 : i64, tpu.core_type = #tpu.core_type<tc>, window_params = [{transform_indices = @transform_0, window_bounds = array<i64: 16, 128>}, {transform_indices = @transform_1, window_bounds = array<i64: 16, 128>}, {transform_indices = @transform_2, window_bounds = array<i64: 16, 128>}, {transform_indices = @transform_3, window_bounds = array<i64: 16, 128>}, {transform_indices = @transform_4, window_bounds = array<i64: 1, 1, 128>}]} {
    %c0_i32 = arith.constant 0 : i32
    %0 = arith.cmpi eq, %arg1, %c0_i32 : i32
    %1 = arith.extui %0 : i1 to i32
    %c0_i32_0 = arith.constant 0 : i32
    %2 = arith.cmpi ne, %1, %c0_i32_0 : i32
    scf.if %2 {
      %cst_17 = arith.constant 0.000000e+00 : f32
      %34 = vector.broadcast %cst_17 : f32 to vector<8x128xf32>
      %c0_18 = arith.constant 0 : index
      %c0_19 = arith.constant 0 : index
      %35 = vector.load %arg7[%c0_18, %c0_19] : memref<8x128xf32, #tpu.memory_space<vmem>>, vector<8x128xf32>
      tpu.vector_store %arg7[%c0_18, %c0_19], %34 {strides = array<i32>} : memref<8x128xf32, #tpu.memory_space<vmem>>, vector<8x128xf32>,
    } else {
    }
    %c0 = arith.constant 0 : index
    %c0_1 = arith.constant 0 : index
    %3 = vector.load %arg2[%c0, %c0_1] : memref<16x128xf32, #tpu.memory_space<vmem>>, vector<16x128xf32>
    %c0_2 = arith.constant 0 : index
    %c0_3 = arith.constant 0 : index
    %4 = vector.load %arg3[%c0_2, %c0_3] : memref<16x128xf32, #tpu.memory_space<vmem>>, vector<16x128xf32>
    %c0_4 = arith.constant 0 : index
    %c0_5 = arith.constant 0 : index
    %5 = vector.load %arg4[%c0_4, %c0_5] : memref<16x128xf32, #tpu.memory_space<vmem>>, vector<16x128xf32>
    %c0_6 = arith.constant 0 : index
    %c0_7 = arith.constant 0 : index
    %6 = vector.load %arg5[%c0_6, %c0_7] : memref<16x128xf32, #tpu.memory_space<vmem>>, vector<16x128xf32>
    %7 = arith.mulf %4, %4 : vector<16x128xf32>
    %8 = arith.mulf %6, %6 : vector<16x128xf32>
    %9 = arith.subf %3, %5 : vector<16x128xf32>
    %10 = tpu.reciprocal %8 {approx = true} : vector<16x128xf32> -> vector<16x128xf32>
    %11 = arith.mulf %8, %10 : vector<16x128xf32>
    %cst = arith.constant 2.000000e+00 : f32
    %12 = vector.broadcast %cst : f32 to vector<16x128xf32>
    %13 = arith.subf %12, %11 : vector<16x128xf32>
    %14 = arith.mulf %10, %13 : vector<16x128xf32>
    %15 = math.log %6 : vector<16x128xf32>
    %16 = math.log %4 : vector<16x128xf32>
    %17 = arith.subf %15, %16 : vector<16x128xf32>
    %18 = arith.mulf %9, %9 : vector<16x128xf32>
    %19 = arith.addf %7, %18 : vector<16x128xf32>
    %cst_8 = arith.constant 5.000000e-01 : f32
    %20 = vector.broadcast %cst_8 : f32 to vector<16x128xf32>
    %21 = arith.mulf %20, %14 : vector<16x128xf32>
    %22 = arith.mulf %19, %21 : vector<16x128xf32>
    %23 = arith.addf %17, %22 : vector<16x128xf32>
    %cst_9 = arith.constant 5.000000e-01 : f32
    %24 = vector.broadcast %cst_9 : f32 to vector<16x128xf32>
    %25 = arith.subf %23, %24 : vector<16x128xf32>
    %c0_10 = arith.constant 0 : index
    %c0_11 = arith.constant 0 : index
    %26 = vector.load %arg7[%c0_10, %c0_11] : memref<8x128xf32, #tpu.memory_space<vmem>>, vector<8x128xf32>
    %27 = vector.shape_cast %25 : vector<16x128xf32> to vector<2x8x128xf32>
    %cst_12 = arith.constant dense<0.000000e+00> : vector<8x128xf32>
    %28 = vector.multi_reduction <add>, %27, %cst_12 [0] : vector<2x8x128xf32> to vector<8x128xf32>
    %29 = arith.addf %26, %28 : vector<8x128xf32>
    %c0_13 = arith.constant 0 : index
    %c0_14 = arith.constant 0 : index
    %30 = vector.load %arg7[%c0_13, %c0_14] : memref<8x128xf32, #tpu.memory_space<vmem>>, vector<8x128xf32>
    tpu.vector_store %arg7[%c0_13, %c0_14], %29 {strides = array<i32>} : memref<8x128xf32, #tpu.memory_space<vmem>>, vector<8x128xf32>,
    %c0_i32_15 = arith.constant 0 : i32
    %31 = arith.cmpi eq, %arg1, %c0_i32_15 : i32
    %32 = arith.extui %31 : i1 to i32
    %c0_i32_16 = arith.constant 0 : i32
    %33 = arith.cmpi ne, %32, %c0_i32_16 : i32
    scf.if %33 {
      %c0_17 = arith.constant 0 : index
      %c0_18 = arith.constant 0 : index
      %34 = vector.load %arg7[%c0_17, %c0_18] : memref<8x128xf32, #tpu.memory_space<vmem>>, vector<8x128xf32>
      %cst_19 = arith.constant dense<0.000000e+00> : vector<128xf32>
      %35 = vector.multi_reduction <add>, %34, %cst_19 [0] : vector<8x128xf32> to vector<128xf32>
      %36 = vector.shape_cast %35 : vector<128xf32> to vector<1x128xf32>
      %37 = vector.shape_cast %36 : vector<1x128xf32> to vector<1x1x128xf32>
      %c0_20 = arith.constant 0 : index
      %c0_21 = arith.constant 0 : index
      %c0_22 = arith.constant 0 : index
      %38 = vector.load %arg6[%c0_20, %c0_21, %c0_22] : memref<1x1x128xf32, #tpu.memory_space<vmem>>, vector<1x1x128xf32>
      tpu.vector_store %arg6[%c0_20, %c0_21, %c0_22], %37 {strides = array<i32>} : memref<1x1x128xf32, #tpu.memory_space<vmem>>, vector<1x1x128xf32>,
    } else {
    }
    return
  }
  func.func @transform_0(%arg0: i32, %arg1: i32) -> (i32, i32) {
    %c1_i32 = arith.constant 1 : i32
    %0 = arith.muli %arg0, %c1_i32 : i32
    %1 = arith.addi %0, %arg1 : i32
    %c0_i32 = arith.constant 0 : i32
    %c0_i32_0 = arith.constant 0 : i32
    return %1, %c0_i32 : i32, i32
  }
  func.func @transform_1(%arg0: i32, %arg1: i32) -> (i32, i32) {
    %c1_i32 = arith.constant 1 : i32
    %0 = arith.muli %arg0, %c1_i32 : i32
    %1 = arith.addi %0, %arg1 : i32
    %c0_i32 = arith.constant 0 : i32
    %c0_i32_0 = arith.constant 0 : i32
    return %1, %c0_i32 : i32, i32
  }
  func.func @transform_2(%arg0: i32, %arg1: i32) -> (i32, i32) {
    %c1_i32 = arith.constant 1 : i32
    %0 = arith.muli %arg0, %c1_i32 : i32
    %1 = arith.addi %0, %arg1 : i32
    %c0_i32 = arith.constant 0 : i32
    %c0_i32_0 = arith.constant 0 : i32
    return %1, %c0_i32 : i32, i32
  }
  func.func @transform_3(%arg0: i32, %arg1: i32) -> (i32, i32) {
    %c1_i32 = arith.constant 1 : i32
    %0 = arith.muli %arg0, %c1_i32 : i32
    %1 = arith.addi %0, %arg1 : i32
    %c0_i32 = arith.constant 0 : i32
    %c0_i32_0 = arith.constant 0 : i32
    return %1, %c0_i32 : i32, i32
  }
  func.func @transform_4(%arg0: i32, %arg1: i32) -> (i32, i32, i32) {
    %c0_i32 = arith.constant 0 : i32
    %c0_i32_0 = arith.constant 0 : i32
    %c0_i32_1 = arith.constant 0 : i32
    return %arg0, %c0_i32, %c0_i32_0 : i32, i32, i32
  }
}

</mosaic_0001>

<bundles_post_ra>
// kernel: tpu_custom_call.1
= control target key start
LH: loop header
LB: loop body
LE: loop exit
PB: predicated region body
PF: predicated region fallthrough
CT: control target
= control target key end

     0   :  { %9 = vsyncpa [#allocation4], 0  ;;  %s366_s0 = inlined_call_operand.hbm [shape: f32[16,128], index: 0, kind: input, shape index: {}]   ;;  %s367_s1 = inlined_call_operand.hbm [shape: f32[16,128], index: 1, kind: input, shape index: {}]   ;;  %s368_s2 = inlined_call_operand.hbm [shape: f32[16,128], index: 2, kind: input, shape index: {}]   ;;  %s369_s3 = inlined_call_operand.hbm [shape: f32[16,128], index: 3, kind: input, shape index: {}]   ;;  %s370_s4 = inlined_call_operand.hbm [shape: f32[1,1,128], index: 4, kind: output, shape index: {}]  }
   0x1   :  { %10 = vsyncpa [#allocation7], 0 }
   0x2   :  { %11 = vsyncpa [#allocation10], 0 }
   0x3   :  { %12 = vsyncpa [#allocation5], 0  ;;  %s307_s15 = smov [#allocation6]   ;;  %s308_s17 = smov [#allocation3]  }
   0x4   :  { %s38_s16 = sshll.u32 %s307_s15, 4  ;;  %s22_s18 = sshll.u32 %s308_s17, 4  ;;  %s39_s16 = int_to_ptr.vmem [resolvable:$true] %s38_s16  ;;  %s23_s18 = int_to_ptr.vmem [resolvable:$true] %s22_s18 }
   0x5   :  { %s207_s19 = scalar_lea.vmem %s39_s16, 256  ;;  %p212_p1 = scmp.lt.s32.totalorder %s39_s16, %s39_s16 }
   0x6   :  { %p208_p0 = scmp.ne.s32.totalorder %s39_s16, %s207_s19  ;;  %p213_p2 = scmp.lt.s32.totalorder %s207_s19, %s207_s19 }
   0x8   :  { %p214_p3 = por %p213_p2, %p212_p1 }
   0xa   :  { %p215_p4 = pnand %p214_p3, %p208_p0 }
   0xc   :  { %218 = shalt.err (!%p215_p4)
}
   0xd   :  { %s309_s20 = smov 128   ;;  %s310_s21 = smov 8  }
   0xe   :  { %44 = dma.hbm_to_vmem [thread:$0]  %s367_s1, 256, %s39_s16, [#allocation7], %s309_s20, %s309_s20, %s310_s21  }
   0xf   :  { %s227_s24 = scalar_lea.vmem %s23_s18, 256  ;;  %p232_p6 = scmp.lt.s32.totalorder %s23_s18, %s23_s18 }
  0x10   :  { %p228_p5 = scmp.ne.s32.totalorder %s23_s18, %s227_s24  ;;  %p233_p7 = scmp.lt.s32.totalorder %s227_s24, %s227_s24 }
  0x12   :  { %p234_p8 = por %p233_p7, %p232_p6 }
  0x14   :  { %p235_p9 = pnand %p234_p8, %p228_p5 }
  0x16   :  { %238 = shalt.err (!%p235_p9)
}
  0x17   :  { %28 = dma.hbm_to_vmem [thread:$0]  %s366_s0, 256, %s23_s18, [#allocation4], %s309_s20, %s309_s20, %s310_s21  }
  0x18   :  { %s311_s27 = smov [#allocation8]   ;;  %s312_s29 = smov [#allocation9]  }
  0x19   :  { %s54_s28 = sshll.u32 %s311_s27, 4  ;;  %s70_s30 = sshll.u32 %s312_s29, 4  ;;  %s55_s28 = int_to_ptr.vmem [resolvable:$true] %s54_s28  ;;  %s71_s30 = int_to_ptr.vmem [resolvable:$true] %s70_s30 }
  0x1a   :  { %s247_s1 = scalar_lea.vmem %s55_s28, 256  ;;  %p252_p11 = scmp.lt.s32.totalorder %s55_s28, %s55_s28 }
  0x1b   :  { %p248_p10 = scmp.ne.s32.totalorder %s55_s28, %s247_s1  ;;  %p253_p12 = scmp.lt.s32.totalorder %s247_s1, %s247_s1 }
  0x1d   :  { %p254_p13 = por %p253_p12, %p252_p11 }
  0x1f   :  { %p255_p0 = pnand %p254_p13, %p248_p10 }
  0x21   :  { %258 = shalt.err (!%p255_p0)
}
  0x22   :  { %60 = dma.hbm_to_vmem [thread:$0]  %s368_s2, 256, %s55_s28, [#allocation7], %s309_s20, %s309_s20, %s310_s21  }
  0x23   :  { %s267_s0 = scalar_lea.vmem %s71_s30, 256  ;;  %p272_p2 = scmp.lt.s32.totalorder %s71_s30, %s71_s30 }
  0x24   :  { %p268_p1 = scmp.ne.s32.totalorder %s71_s30, %s267_s0  ;;  %p273_p3 = scmp.lt.s32.totalorder %s267_s0, %s267_s0 }
  0x26   :  { %p274_p4 = por %p273_p3, %p272_p2 }
  0x28   :  { %p275_p5 = pnand %p274_p4, %p268_p1 }
  0x2a   :  { %278 = shalt.err (!%p275_p5)
}
  0x2b   :  { %76 = dma.hbm_to_vmem [thread:$0]  %s369_s3, 256, %s71_s30, [#allocation10], %s309_s20, %s309_s20, %s310_s21  }
  0x2c   :  { %299 = dma.done.wait [#allocation4], 256  }
  0x2d   :  { %300 = vsyncadd [#allocation4], 4294967040 }
  0x2e   :  { %301 = dma.done.wait [#allocation7], 512  }
  0x2f   :  { %302 = vsyncadd [#allocation7], 4294966784 }
  0x30   :  { %303 = dma.done.wait [#allocation10], 256  }
  0x31   :  { %304 = vsyncadd [#allocation10], 4294967040  ;;  %v104_v0 = vld [vmem:[#allocation6] sm:$0xff]  ;;  %v105_v1 = vld [vmem:[#allocation6 + $0x8] sm:$0xff]  ;;  %s313_s2 = smov [#allocation11]  }
  0x32   :  { %187 = vlog2.f32 %v104_v0  ;;  %v108_v2 = vld [vmem:[#allocation9] sm:$0xff]  ;;  %v109_v3 = vld [vmem:[#allocation9 + $0x8] sm:$0xff]  ;;  %v102_v6 = vld [vmem:[#allocation3] sm:$0xff]  ;;  %v110_v18 = vmul.f32 %v104_v0, %v104_v0  ;;  %v111_v21 = vmul.f32 %v105_v1, %v105_v1  ;;  %s167_s3 = sshll.u32 %s313_s2, 4  ;;  %s168_s3 = int_to_ptr.vmem [resolvable:$true] %s167_s3 }
  0x33   :  { %189 = vlog2.f32 %v105_v1  ;;  %v112_v4 = vmul.f32 %v108_v2, %v108_v2  ;;  %v113_v5 = vmul.f32 %v109_v3, %v109_v3  ;;  %v106_v7 = vld [vmem:[#allocation8] sm:$0xff]  ;;  %v103_v8 = vld [vmem:[#allocation3 + $0x8] sm:$0xff]  ;;  %s279_s9 = scalar_lea.vmem %s168_s3, 16  ;;  %s283_s10 = scalar_lea.vmem %s168_s3, 32 }
  0x34   :  { %191 = vlog2.f32 %v108_v2  ;;  %v107_v9 = vld [vmem:[#allocation8 + $0x8] sm:$0xff]  ;;  %v114_v12 = vsub.f32 %v102_v6, %v106_v7  ;;  %p280_p6 = scmp.ne.s32.totalorder %s168_s3, %s279_s9  ;;  %p284_p7 = scmp.lt.s32.totalorder %s168_s3, %s168_s3 }
  0x35   :  { %193 = vlog2.f32 %v109_v3  ;;  %v115_v14 = vsub.f32 %v103_v8, %v107_v9  ;;  %p285_p8 = scmp.lt.s32.totalorder %s283_s10, %s279_s9 }
  0x36   :  { %195 = vrcp.f32 %v112_v4  ;;  %v134_v20 = vmul.f32 %v114_v12, %v114_v12 }
  0x37   :  { %197 = vrcp.f32 %v113_v5  ;;  %v135_v23 = vmul.f32 %v115_v14, %v115_v14  ;;  %p286_p9 = por %p285_p8, %p284_p7 }
  0x38   :  { %v136_v31 = vadd.f32 %v134_v20, %v110_v18 }
  0x39   :  { %v137_v33 = vadd.f32 %v135_v23, %v111_v21  ;;  %p287_p10 = pnand %p286_p9, %p280_p6 }
  0x3f   :  { %v188_v10 = vpop.eup %187 }
  0x40   :  { %v190_v11 = vpop.eup %189  ;;  %v129_v26 = vmul.f32 0.6931472, %v188_v10 }
  0x41   :  { %v192_v13 = vpop.eup %191  ;;  %v131_v29 = vmul.f32 0.6931472, %v190_v11 }
  0x42   :  { %v194_v15 = vpop.eup %193  ;;  %v125_v25 = vmul.f32 0.6931472, %v192_v13 }
  0x43   :  { %v196_v16 = vpop.eup %195  ;;  %v127_v28 = vmul.f32 0.6931472, %v194_v15 }
  0x44   :  { %v198_v17 = vpop.eup %197  ;;  %v118_v19 = vmul.f32 %v196_v16, %v112_v4  ;;  %v132_v34 = vsub.f32 %v125_v25, %v129_v26 }
  0x45   :  { %v119_v22 = vmul.f32 %v198_v17, %v113_v5  ;;  %v133_v36 = vsub.f32 %v127_v28, %v131_v29 }
  0x46   :  { %v120_v24 = vsub.f32 2.0, %v118_v19 }
  0x47   :  { %v121_v27 = vsub.f32 2.0, %v119_v22 }
  0x48   :  { %v122_v30 = vmul.f32 %v196_v16, %v120_v24 }
  0x49   :  { %v123_v32 = vmul.f32 %v198_v17, %v121_v27 }
  0x4a   :  { %v138_v35 = vmul.f32 0.5, %v122_v30 }
  0x4b   :  { %v139_v37 = vmul.f32 0.5, %v123_v32 }
  0x4c   :  { %v140_v38 = vmul.f32 %v138_v35, %v136_v31 }
  0x4d   :  { %v141_v39 = vmul.f32 %v139_v37, %v137_v33 }
  0x4e   :  { %v142_v40 = vadd.f32 %v140_v38, %v132_v34 }
  0x4f   :  { %v143_v41 = vadd.f32 %v141_v39, %v133_v36 }
  0x50   :  { %v178_v42 = vadd.f32 -0.5, %v142_v40 }
  0x51   :  { %v179_v43 = vadd.f32 -0.5, %v143_v41 }
  0x53   :  { %v147_v44 = vadd.f32 %v179_v43, %v178_v42 }
  0x55   :  { %v154_v45 = vrot.slane %v147_v44, 4 }
  0x57   :  { %v155_v46 = vadd.f32 %v154_v45, %v147_v44 }
  0x59   :  { %v156_v47 = vrot.slane %v155_v46, 2 }
  0x5b   :  { %v157_v48 = vadd.f32 %v156_v47, %v155_v46 }
  0x5d   :  { %v158_v49 = vrot.slane %v157_v48, 1 }
  0x5f   :  { %v159_v50 = vadd.f32 %v158_v49, %v157_v48 }
  0x61   :  { %160 = vst [vmem:[#allocation11] sm:$0x1] %v159_v50 }
  0x62   :  { %290 = shalt.err (!%p287_p10)
}
  0x63   :  { %170 = dma.vmem_to_hbm [thread:$0]  %s168_s3, 16, %s370_s4, [#allocation5]  }
  0x64   :  { %305 = dma.done.wait [#allocation5], 16  }
  0x65   :  { %306 = vsyncadd [#allocation5], 4294967280 }
  0x66   :  { %174 = vsyncpa [#allocation4], 1 }
  0x67   :  { %175 = vsyncpa [#allocation7], 1 }
  0x68   :  { %176 = vsyncpa [#allocation10], 1 }
  0x69   :  { %177 = vsyncpa [#allocation5], 1 }

</bundles_post_ra>
